<compile_context>
chip_gen: v7x
topology: tpu7x:2x2x1
jax: 0.10.0
libtpu: 0.0.40
codegen_flags: <defaults>
</compile_context>

<pallas_src>
import functools

import jax
import jax.numpy as jnp
from jax.experimental import pallas as pl
from jax.experimental.pallas import tpu as pltpu


def weightnet_kernel(x_ref, wf_ref, bf_ref, wb_ref, bb_ref, wo_ref, bo_ref,
                     out_ref, h_ref, *, n_per_group, groups, eps, matmul_dtype):
    """One grid step = one resnet block `d` of one (super-)batch element.

    x_ref : (1, Cin, G*N)   VMEM, f32 (G batch elements folded onto lanes)
    wf_ref: (C, Cin)        first_conv weight (PyTorch (out, in) layout), f32
    bf_ref: (C, 1)          first_conv bias, f32
    wb_ref: (2, C, C)       this block's two conv weights, bf16 (pipelined per d)
    bb_ref: (2, C, 1)       this block's two conv biases, f32
    wo_ref: (C, 1)          final_conv weight (transposed (1, C)), f32
    bo_ref: (1, 1)          final_conv bias, f32
    out_ref: (1, 1, G*N)    per-point logits (lane-dense)
    h_ref : (C, G*N) f32    persistent scratch carrying the residual stream
    """
    d = pl.program_id(1)
    n_blocks = pl.num_programs(1)
    inv_n = 1.0 / float(n_per_group)

    # d == 0: first_conv Cin=4 -> C. K=4 would fill only 4 MXU rows, so do it
    # as Cin broadcast multiply-adds on the VPU. Full overwrite of h_ref, so
    # there is no stale state when the batch grid axis advances.
    @pl.when(d == 0)
    def _():
        x = x_ref[0]                       # (Cin, G*N) f32
        wf = wf_ref[...]                   # (C, Cin)   f32
        cin = x.shape[0]
        h0 = wf[:, 0:1] * x[0:1, :]
        for k in range(1, cin):
            h0 = h0 + wf[:, k:k + 1] * x[k:k + 1, :]
        h_ref[...] = h0 + bf_ref[...]

    h = h_ref[...]                         # (C, G*N) f32 residual stream

    # ---- resnet block d: two CxC pointwise convs on the MXU ----------------
    # j = 0: conv -> per-group context norm -> ReLU, emitted directly in bf16
    # (fused pack: feeds the j=1 matmul with no extra f32->bf16 traversal).
    t0 = jnp.dot(wb_ref[0], h.astype(matmul_dtype),
                 preferred_element_type=jnp.float32) + bb_ref[0]
    parts = []
    for g in range(groups):                # groups is a small static constant
        sl = slice(g * n_per_group, (g + 1) * n_per_group)
        tg = t0[:, sl]
        mu = jnp.sum(tg, axis=1, keepdims=True) * inv_n          # (C, 1)
        ex2 = jnp.sum(tg * tg, axis=1, keepdims=True) * inv_n    # (C, 1)
        var = jnp.maximum(ex2 - mu * mu, 0.0)
        scale = jax.lax.rsqrt(var + eps)                         # EUP
        parts.append(jnp.maximum((tg - mu) * scale, 0.0).astype(matmul_dtype))
    t0n = parts[0] if groups == 1 else jnp.concatenate(parts, axis=1)

    # j = 1: conv -> per-group context norm -> ReLU fused with the residual
    # add, written straight into the h scratch (single elementwise pass).
    t1 = jnp.dot(wb_ref[1], t0n, preferred_element_type=jnp.float32) + bb_ref[1]
    for g in range(groups):
        sl = slice(g * n_per_group, (g + 1) * n_per_group)
        tg = t1[:, sl]
        mu = jnp.sum(tg, axis=1, keepdims=True) * inv_n
        ex2 = jnp.sum(tg * tg, axis=1, keepdims=True) * inv_n
        var = jnp.maximum(ex2 - mu * mu, 0.0)
        scale = jax.lax.rsqrt(var + eps)
        h_ref[:, sl] = h[:, sl] + jnp.maximum((tg - mu) * scale, 0.0)

    # d == last: final_conv C -> 1 as a VPU weighted sum over channels
    # (sublane reduce on the XLU), producing a lane-dense (1, G*N) row.
    @pl.when(d == n_blocks - 1)
    def _():
        hf = h_ref[...]
        logit = jnp.sum(hf * wo_ref[...], axis=0, keepdims=True) + bo_ref[...]
        out_ref[0] = logit.astype(out_ref.dtype)


def _single_tensorcore_chip():
    """Heuristic: v5e/v6e have 1 TensorCore per chip; v4/v5p/v7x have 2."""
    try:
        kind = jax.devices()[0].device_kind.lower()
    except Exception:
        return True
    return not any(tag in kind for tag in ("v4", "v5p", "v7"))


def _vmem_limit_bytes(cin, c, gn, matmul_dtype):
    f32 = 4
    wb = jnp.dtype(matmul_dtype).itemsize
    act = c * gn * f32
    est = (
        2 * (cin * gn * f32)                       # x, double-buffered
        + 2 * (gn * f32)                           # out, double-buffered
        + 2 * (2 * c * c * wb + 2 * c * f32)       # per-block w/b, double-buffered
        + (c * cin + 2 * c + 2) * f32              # batch-invariant small operands
        + act                                      # persistent h scratch
        + 8 * act                                  # t0/t1/norm temporaries + margin
    )
    # Keep well under v7x's 64 MiB physical VMEM (<= ~48 MiB budget).
    return int(min(max(est, 16 << 20), 48 << 20))


def weightnet_forward(x_nchw, params, *, depth, eps=1e-5,
                      matmul_dtype=jnp.bfloat16, group_size=None):
    """x_nchw: [B, C_in, 1, N] (PyTorch NCHW). Returns logits [B, N]."""
    B, Cin, one, N = x_nchw.shape
    assert one == 1
    C = params["w_first"].shape[0]

    # Fold G batch elements onto the lane axis on single-TC chips; keep the
    # batch on a "parallel" grid axis on 2-TC chips (megacore).
    if group_size is None:
        group_size = B if _single_tensorcore_chip() else 1
    assert B % group_size == 0
    G = group_size
    SB = B // G
    GN = G * N

    x = x_nchw[:, :, 0, :].astype(jnp.float32)                     # (B, Cin, N)
    x = x.reshape(SB, G, Cin, N).transpose(0, 2, 1, 3).reshape(SB, Cin, GN)
    w_blocks = params["w_blocks"].astype(matmul_dtype)             # bf16 MXU operands

    kernel = functools.partial(weightnet_kernel, n_per_group=N, groups=G,
                               eps=eps, matmul_dtype=matmul_dtype)

    out = pl.pallas_call(
        kernel,
        out_shape=jax.ShapeDtypeStruct((SB, 1, GN), jnp.float32),
        grid_spec=pltpu.PrefetchScalarGridSpec(
            num_scalar_prefetch=0,
            grid=(SB, depth),                                      # depth innermost
            in_specs=[
                pl.BlockSpec((1, Cin, GN), lambda b, d: (b, 0, 0)),   # x (fetched once per b)
                pl.BlockSpec((C, Cin), lambda b, d: (0, 0)),          # w_first
                pl.BlockSpec((C, 1), lambda b, d: (0, 0)),            # b_first
                pl.BlockSpec((2, C, C), lambda b, d: (d, 0, 0)),      # block d weights (pipelined)
                pl.BlockSpec((2, C, 1), lambda b, d: (d, 0, 0)),      # block d biases (pipelined)
                pl.BlockSpec((C, 1), lambda b, d: (0, 0)),            # w_final
                pl.BlockSpec((1, 1), lambda b, d: (0, 0)),            # b_final
            ],
            out_specs=pl.BlockSpec((1, 1, GN), lambda b, d: (b, 0, 0)),  # lane-dense
            scratch_shapes=[pltpu.VMEM((C, GN), jnp.float32)],           # residual stream h
        ),
        compiler_params=pltpu.CompilerParams(
            dimension_semantics=("parallel", "arbitrary"),
            vmem_limit_bytes=_vmem_limit_bytes(Cin, C, GN, matmul_dtype)),
    )(x, params["w_first"], params["b_first"], w_blocks,
      params["b_blocks"], params["w_final"], params["b_final"])

    # logits = x.view(batch_size, n_cor)
    return out.reshape(SB, G, N).reshape(B, N)


def weightnet_reference(x_nchw, params, *, depth, eps=1e-5,
                        matmul_dtype=jnp.bfloat16):
    """Pure-JAX reference of the same forward (same bf16-weight regime)."""
    B, Cin, _, N = x_nchw.shape
    x = x_nchw[:, :, 0, :].astype(jnp.float32)             # (B, Cin, N)
    h = jnp.einsum("ok,bkn->bon", params["w_first"], x,
                   precision=jax.lax.Precision.HIGHEST) + params["b_first"][None]
    wb = params["w_blocks"].astype(matmul_dtype)
    for d in range(depth):
        t = h
        for j in range(2):
            idx = 2 * d + j
            t = jnp.einsum("oc,bcn->bon", wb[idx], t.astype(matmul_dtype),
                           preferred_element_type=jnp.float32) + params["b_blocks"][idx][None]
            mu = jnp.mean(t, axis=2, keepdims=True)
            var = jnp.mean(jnp.square(t - mu), axis=2, keepdims=True)
            t = (t - mu) * jax.lax.rsqrt(var + eps)
            t = jnp.maximum(t, 0.0)
        h = h + t
    logit = jnp.sum(h * params["w_final"][None], axis=1) + params["b_final"][0, 0]
    return logit  # (B, N)


def init_params(key, in_channels, out_channels, depth):
    k1, k2, k3, k4, k5, k6 = jax.random.split(key, 6)
    C = out_channels
    return {
        # PyTorch Conv1d weight layout (out_channels, in_channels), ksize=1.
        "w_first": 0.1 * jax.random.normal(k1, (C, in_channels), jnp.float32),
        "b_first": 0.1 * jax.random.normal(k2, (C, 1), jnp.float32),
        "w_blocks": 0.1 * jax.random.normal(k3, (2 * depth, C, C), jnp.float32),
        "b_blocks": 0.1 * jax.random.normal(k4, (2 * depth, C, 1), jnp.float32),
        # final_conv weight stored transposed: (C, 1) instead of PyTorch (1, C).
        "w_final": 0.1 * jax.random.normal(k5, (C, 1), jnp.float32),
        "b_final": 0.1 * jax.random.normal(k6, (1, 1), jnp.float32),
    }


if __name__ == "__main__":
    # Module-consistent small shapes: depth=2 resnet blocks, 4 input channels
    # ([x1, x2, y1, y2]), 32 hidden channels, N=128 correspondences, batch=2.
    B, Cin, C, N, depth = 2, 4, 32, 128, 2

    key = jax.random.PRNGKey(0)
    kx, kp = jax.random.split(key)
    x_in = jax.random.normal(kx, (B, Cin, 1, N), jnp.float32)  # NCHW [B, 4, 1, N]
    params = init_params(kp, Cin, C, depth)

    logits = weightnet_forward(x_in, params, depth=depth)
    logits = jax.block_until_ready(logits)
    assert logits.shape == (B, N), logits.shape

    ref = weightnet_reference(x_in, params, depth=depth)
    max_err = float(jnp.max(jnp.abs(logits - ref)))
    assert jnp.allclose(logits, ref, atol=1e-3, rtol=1e-3), max_err

    # Also exercise the non-folded (per-batch grid / megacore) path.
    logits_nf = jax.block_until_ready(
        weightnet_forward(x_in, params, depth=depth, group_size=1))
    assert jnp.allclose(logits_nf, ref, atol=1e-3, rtol=1e-3)

    print("KERNEL_OK")
</pallas_src>

<mosaic_0001>
module attributes {stable_mosaic.version = 11 : i64} {
  func.func @weightnet_kernel(%arg0: i32, %arg1: i32, %arg2: memref<1x4x256xf32, #tpu.memory_space<vmem>>, %arg3: memref<32x4xf32, #tpu.memory_space<vmem>>, %arg4: memref<32x1xf32, #tpu.memory_space<vmem>>, %arg5: memref<2x32x32xbf16, #tpu.memory_space<vmem>>, %arg6: memref<2x32x1xf32, #tpu.memory_space<vmem>>, %arg7: memref<32x1xf32, #tpu.memory_space<vmem>>, %arg8: memref<1x1xf32, #tpu.memory_space<vmem>>, %arg9: memref<1x1x256xf32, #tpu.memory_space<vmem>>, %arg10: memref<32x256xf32, #tpu.memory_space<vmem>>) attributes {dimension_semantics = [#tpu.dimension_semantics<parallel>, #tpu.dimension_semantics<arbitrary>], iteration_bounds = array<i64: 1, 2>, scalar_prefetch = 0 : i64, scratch_operands = 1 : i64, tpu.core_type = #tpu.core_type<tc>, window_params = [{transform_indices = @transform_0, window_bounds = array<i64: 1, 4, 256>}, {pipeline_mode = #tpu.pipeline_mode<synchronous>, transform_indices = @transform_1, window_bounds = array<i64: 32, 4>}, {pipeline_mode = #tpu.pipeline_mode<synchronous>, transform_indices = @transform_2, window_bounds = array<i64: 32, 1>}, {transform_indices = @transform_3, window_bounds = array<i64: 2, 32, 32>}, {transform_indices = @transform_4, window_bounds = array<i64: 2, 32, 1>}, {pipeline_mode = #tpu.pipeline_mode<synchronous>, transform_indices = @transform_5, window_bounds = array<i64: 32, 1>}, {pipeline_mode = #tpu.pipeline_mode<synchronous>, transform_indices = @transform_6, window_bounds = array<i64: 1, 1>}, {transform_indices = @transform_7, window_bounds = array<i64: 1, 1, 256>}]} {
    %c0_i32 = arith.constant 0 : i32
    %0 = arith.cmpi eq, %arg1, %c0_i32 : i32
    %1 = arith.extui %0 : i1 to i32
    %c0_i32_0 = arith.constant 0 : i32
    %2 = arith.cmpi ne, %1, %c0_i32_0 : i32
    scf.if %2 {
      %c0_46 = arith.constant 0 : index
      %c0_47 = arith.constant 0 : index
      %c0_48 = arith.constant 0 : index
      %123 = vector.load %arg2[%c0_46, %c0_47, %c0_48] : memref<1x4x256xf32, #tpu.memory_space<vmem>>, vector<1x4x256xf32>
      %124 = vector.shape_cast %123 : vector<1x4x256xf32> to vector<4x256xf32>
      %c0_49 = arith.constant 0 : index
      %c0_50 = arith.constant 0 : index
      %125 = vector.load %arg3[%c0_49, %c0_50] : memref<32x4xf32, #tpu.memory_space<vmem>>, vector<32x4xf32>
      %126 = vector.extract_strided_slice %125 {offsets = [0, 0], sizes = [32, 1], strides = [1, 1]} : vector<32x4xf32> to vector<32x1xf32>
      %127 = vector.extract_strided_slice %124 {offsets = [0, 0], sizes = [1, 256], strides = [1, 1]} : vector<4x256xf32> to vector<1x256xf32>
      %128 = vector.broadcast %126 : vector<32x1xf32> to vector<32x256xf32>
      %129 = vector.broadcast %127 : vector<1x256xf32> to vector<32x256xf32>
      %130 = arith.mulf %128, %129 : vector<32x256xf32>
      %131 = vector.extract_strided_slice %125 {offsets = [0, 1], sizes = [32, 1], strides = [1, 1]} : vector<32x4xf32> to vector<32x1xf32>
      %132 = vector.extract_strided_slice %124 {offsets = [1, 0], sizes = [1, 256], strides = [1, 1]} : vector<4x256xf32> to vector<1x256xf32>
      %133 = vector.broadcast %131 : vector<32x1xf32> to vector<32x256xf32>
      %134 = vector.broadcast %132 : vector<1x256xf32> to vector<32x256xf32>
      %135 = arith.mulf %133, %134 : vector<32x256xf32>
      %136 = arith.addf %130, %135 : vector<32x256xf32>
      %137 = vector.extract_strided_slice %125 {offsets = [0, 2], sizes = [32, 1], strides = [1, 1]} : vector<32x4xf32> to vector<32x1xf32>
      %138 = vector.extract_strided_slice %124 {offsets = [2, 0], sizes = [1, 256], strides = [1, 1]} : vector<4x256xf32> to vector<1x256xf32>
      %139 = vector.broadcast %137 : vector<32x1xf32> to vector<32x256xf32>
      %140 = vector.broadcast %138 : vector<1x256xf32> to vector<32x256xf32>
      %141 = arith.mulf %139, %140 : vector<32x256xf32>
      %142 = arith.addf %136, %141 : vector<32x256xf32>
      %143 = vector.extract_strided_slice %125 {offsets = [0, 3], sizes = [32, 1], strides = [1, 1]} : vector<32x4xf32> to vector<32x1xf32>
      %144 = vector.extract_strided_slice %124 {offsets = [3, 0], sizes = [1, 256], strides = [1, 1]} : vector<4x256xf32> to vector<1x256xf32>
      %145 = vector.broadcast %143 : vector<32x1xf32> to vector<32x256xf32>
      %146 = vector.broadcast %144 : vector<1x256xf32> to vector<32x256xf32>
      %147 = arith.mulf %145, %146 : vector<32x256xf32>
      %148 = arith.addf %142, %147 : vector<32x256xf32>
      %c0_51 = arith.constant 0 : index
      %c0_52 = arith.constant 0 : index
      %149 = vector.load %arg4[%c0_51, %c0_52] : memref<32x1xf32, #tpu.memory_space<vmem>>, vector<32x1xf32>
      %150 = vector.broadcast %149 : vector<32x1xf32> to vector<32x256xf32>
      %151 = arith.addf %148, %150 : vector<32x256xf32>
      %c0_53 = arith.constant 0 : index
      %c0_54 = arith.constant 0 : index
      %152 = vector.load %arg10[%c0_53, %c0_54] : memref<32x256xf32, #tpu.memory_space<vmem>>, vector<32x256xf32>
      tpu.vector_store %arg10[%c0_53, %c0_54], %151 {strides = array<i32>} : memref<32x256xf32, #tpu.memory_space<vmem>>, vector<32x256xf32>,
    } else {
    }
    %c0 = arith.constant 0 : index
    %c0_1 = arith.constant 0 : index
    %3 = vector.load %arg10[%c0, %c0_1] : memref<32x256xf32, #tpu.memory_space<vmem>>, vector<32x256xf32>
    %c0_2 = arith.constant 0 : index
    %c0_3 = arith.constant 0 : index
    %c0_4 = arith.constant 0 : index
    %4 = vector.load %arg5[%c0_2, %c0_3, %c0_4] : memref<2x32x32xbf16, #tpu.memory_space<vmem>>, vector<1x32x32xbf16>
    %5 = vector.shape_cast %4 : vector<1x32x32xbf16> to vector<32x32xbf16>
    %6 = arith.truncf %3 : vector<32x256xf32> to vector<32x256xbf16>
    %cst = arith.constant dense<0.000000e+00> : vector<32x256xf32>
    %7 = tpu.matmul %5, %6, %cst {dimension_numbers = #tpu.dot_dimension_numbers<[1], [0], [0], [1], [0, 0, 1, 1], [], []>} : vector<32x32xbf16>, vector<32x256xbf16>, vector<32x256xf32> -> vector<32x256xf32>
    %c0_5 = arith.constant 0 : index
    %c0_6 = arith.constant 0 : index
    %c0_7 = arith.constant 0 : index
    %8 = vector.load %arg6[%c0_5, %c0_6, %c0_7] : memref<2x32x1xf32, #tpu.memory_space<vmem>>, vector<1x32x1xf32>
    %9 = vector.shape_cast %8 : vector<1x32x1xf32> to vector<32x1xf32>
    %10 = vector.broadcast %9 : vector<32x1xf32> to vector<32x256xf32>
    %11 = arith.addf %7, %10 : vector<32x256xf32>
    %12 = vector.extract_strided_slice %11 {offsets = [0, 0], sizes = [32, 128], strides = [1, 1]} : vector<32x256xf32> to vector<32x128xf32>
    %cst_8 = arith.constant dense<0.000000e+00> : vector<32xf32>
    %13 = vector.multi_reduction <add>, %12, %cst_8 [1] : vector<32x128xf32> to vector<32xf32>
    %14 = vector.shape_cast %13 : vector<32xf32> to vector<32x1xf32>
    %cst_9 = arith.constant 7.812500e-03 : f32
    %15 = vector.broadcast %cst_9 : f32 to vector<32x1xf32>
    %16 = arith.mulf %14, %15 : vector<32x1xf32>
    %17 = arith.mulf %12, %12 : vector<32x128xf32>
    %cst_10 = arith.constant dense<0.000000e+00> : vector<32xf32>
    %18 = vector.multi_reduction <add>, %17, %cst_10 [1] : vector<32x128xf32> to vector<32xf32>
    %19 = vector.shape_cast %18 : vector<32xf32> to vector<32x1xf32>
    %cst_11 = arith.constant 7.812500e-03 : f32
    %20 = vector.broadcast %cst_11 : f32 to vector<32x1xf32>
    %21 = arith.mulf %19, %20 : vector<32x1xf32>
    %22 = arith.mulf %16, %16 : vector<32x1xf32>
    %23 = arith.subf %21, %22 : vector<32x1xf32>
    %cst_12 = arith.constant 0.000000e+00 : f32
    %24 = vector.broadcast %cst_12 : f32 to vector<32x1xf32>
    %25 = arith.maximumf %23, %24 : vector<32x1xf32>
    %cst_13 = arith.constant 9.99999974E-6 : f32
    %26 = vector.broadcast %cst_13 : f32 to vector<32x1xf32>
    %27 = arith.addf %25, %26 : vector<32x1xf32>
    %28 = math.rsqrt %27 : vector<32x1xf32>
    %29 = vector.broadcast %16 : vector<32x1xf32> to vector<32x128xf32>
    %30 = arith.subf %12, %29 : vector<32x128xf32>
    %31 = vector.broadcast %28 : vector<32x1xf32> to vector<32x128xf32>
    %32 = arith.mulf %30, %31 : vector<32x128xf32>
    %cst_14 = arith.constant 0.000000e+00 : f32
    %33 = vector.broadcast %cst_14 : f32 to vector<32x128xf32>
    %34 = arith.maximumf %32, %33 : vector<32x128xf32>
    %35 = arith.truncf %34 : vector<32x128xf32> to vector<32x128xbf16>
    %36 = vector.extract_strided_slice %11 {offsets = [0, 128], sizes = [32, 128], strides = [1, 1]} : vector<32x256xf32> to vector<32x128xf32>
    %cst_15 = arith.constant dense<0.000000e+00> : vector<32xf32>
    %37 = vector.multi_reduction <add>, %36, %cst_15 [1] : vector<32x128xf32> to vector<32xf32>
    %38 = vector.shape_cast %37 : vector<32xf32> to vector<32x1xf32>
    %cst_16 = arith.constant 7.812500e-03 : f32
    %39 = vector.broadcast %cst_16 : f32 to vector<32x1xf32>
    %40 = arith.mulf %38, %39 : vector<32x1xf32>
    %41 = arith.mulf %36, %36 : vector<32x128xf32>
    %cst_17 = arith.constant dense<0.000000e+00> : vector<32xf32>
    %42 = vector.multi_reduction <add>, %41, %cst_17 [1] : vector<32x128xf32> to vector<32xf32>
    %43 = vector.shape_cast %42 : vector<32xf32> to vector<32x1xf32>
    %cst_18 = arith.constant 7.812500e-03 : f32
    %44 = vector.broadcast %cst_18 : f32 to vector<32x1xf32>
    %45 = arith.mulf %43, %44 : vector<32x1xf32>
    %46 = arith.mulf %40, %40 : vector<32x1xf32>
    %47 = arith.subf %45, %46 : vector<32x1xf32>
    %cst_19 = arith.constant 0.000000e+00 : f32
    %48 = vector.broadcast %cst_19 : f32 to vector<32x1xf32>
    %49 = arith.maximumf %47, %48 : vector<32x1xf32>
    %cst_20 = arith.constant 9.99999974E-6 : f32
    %50 = vector.broadcast %cst_20 : f32 to vector<32x1xf32>
    %51 = arith.addf %49, %50 : vector<32x1xf32>
    %52 = math.rsqrt %51 : vector<32x1xf32>
    %53 = vector.broadcast %40 : vector<32x1xf32> to vector<32x128xf32>
    %54 = arith.subf %36, %53 : vector<32x128xf32>
    %55 = vector.broadcast %52 : vector<32x1xf32> to vector<32x128xf32>
    %56 = arith.mulf %54, %55 : vector<32x128xf32>
    %cst_21 = arith.constant 0.000000e+00 : f32
    %57 = vector.broadcast %cst_21 : f32 to vector<32x128xf32>
    %58 = arith.maximumf %56, %57 : vector<32x128xf32>
    %59 = arith.truncf %58 : vector<32x128xf32> to vector<32x128xbf16>
    %60 = tpu.concatenate %35, %59 in 1 : vector<32x128xbf16>, vector<32x128xbf16> -> vector<32x256xbf16>
    %c1 = arith.constant 1 : index
    %c0_22 = arith.constant 0 : index
    %c0_23 = arith.constant 0 : index
    %61 = vector.load %arg5[%c1, %c0_22, %c0_23] : memref<2x32x32xbf16, #tpu.memory_space<vmem>>, vector<1x32x32xbf16>
    %62 = vector.shape_cast %61 : vector<1x32x32xbf16> to vector<32x32xbf16>
    %cst_24 = arith.constant dense<0.000000e+00> : vector<32x256xf32>
    %63 = tpu.matmul %62, %60, %cst_24 {dimension_numbers = #tpu.dot_dimension_numbers<[1], [0], [0], [1], [0, 0, 1, 1], [], []>} : vector<32x32xbf16>, vector<32x256xbf16>, vector<32x256xf32> -> vector<32x256xf32>
    %c1_25 = arith.constant 1 : index
    %c0_26 = arith.constant 0 : index
    %c0_27 = arith.constant 0 : index
    %64 = vector.load %arg6[%c1_25, %c0_26, %c0_27] : memref<2x32x1xf32, #tpu.memory_space<vmem>>, vector<1x32x1xf32>
    %65 = vector.shape_cast %64 : vector<1x32x1xf32> to vector<32x1xf32>
    %66 = vector.broadcast %65 : vector<32x1xf32> to vector<32x256xf32>
    %67 = arith.addf %63, %66 : vector<32x256xf32>
    %68 = vector.extract_strided_slice %67 {offsets = [0, 0], sizes = [32, 128], strides = [1, 1]} : vector<32x256xf32> to vector<32x128xf32>
    %cst_28 = arith.constant dense<0.000000e+00> : vector<32xf32>
    %69 = vector.multi_reduction <add>, %68, %cst_28 [1] : vector<32x128xf32> to vector<32xf32>
    %70 = vector.shape_cast %69 : vector<32xf32> to vector<32x1xf32>
    %cst_29 = arith.constant 7.812500e-03 : f32
    %71 = vector.broadcast %cst_29 : f32 to vector<32x1xf32>
    %72 = arith.mulf %70, %71 : vector<32x1xf32>
    %73 = arith.mulf %68, %68 : vector<32x128xf32>
    %cst_30 = arith.constant dense<0.000000e+00> : vector<32xf32>
    %74 = vector.multi_reduction <add>, %73, %cst_30 [1] : vector<32x128xf32> to vector<32xf32>
    %75 = vector.shape_cast %74 : vector<32xf32> to vector<32x1xf32>
    %cst_31 = arith.constant 7.812500e-03 : f32
    %76 = vector.broadcast %cst_31 : f32 to vector<32x1xf32>
    %77 = arith.mulf %75, %76 : vector<32x1xf32>
    %78 = arith.mulf %72, %72 : vector<32x1xf32>
    %79 = arith.subf %77, %78 : vector<32x1xf32>
    %cst_32 = arith.constant 0.000000e+00 : f32
    %80 = vector.broadcast %cst_32 : f32 to vector<32x1xf32>
    %81 = arith.maximumf %79, %80 : vector<32x1xf32>
    %cst_33 = arith.constant 9.99999974E-6 : f32
    %82 = vector.broadcast %cst_33 : f32 to vector<32x1xf32>
    %83 = arith.addf %81, %82 : vector<32x1xf32>
    %84 = math.rsqrt %83 : vector<32x1xf32>
    %85 = vector.extract_strided_slice %3 {offsets = [0, 0], sizes = [32, 128], strides = [1, 1]} : vector<32x256xf32> to vector<32x128xf32>
    %86 = vector.broadcast %72 : vector<32x1xf32> to vector<32x128xf32>
    %87 = arith.subf %68, %86 : vector<32x128xf32>
    %88 = vector.broadcast %84 : vector<32x1xf32> to vector<32x128xf32>
    %89 = arith.mulf %87, %88 : vector<32x128xf32>
    %cst_34 = arith.constant 0.000000e+00 : f32
    %90 = vector.broadcast %cst_34 : f32 to vector<32x128xf32>
    %91 = arith.maximumf %89, %90 : vector<32x128xf32>
    %92 = arith.addf %85, %91 : vector<32x128xf32>
    %c0_35 = arith.constant 0 : index
    %c0_36 = arith.constant 0 : index
    %93 = vector.load %arg10[%c0_35, %c0_36] : memref<32x256xf32, #tpu.memory_space<vmem>>, vector<32x128xf32>
    tpu.vector_store %arg10[%c0_35, %c0_36], %92 {strides = array<i32>} : memref<32x256xf32, #tpu.memory_space<vmem>>, vector<32x128xf32>,
    %94 = vector.extract_strided_slice %67 {offsets = [0, 128], sizes = [32, 128], strides = [1, 1]} : vector<32x256xf32> to vector<32x128xf32>
    %cst_37 = arith.constant dense<0.000000e+00> : vector<32xf32>
    %95 = vector.multi_reduction <add>, %94, %cst_37 [1] : vector<32x128xf32> to vector<32xf32>
    %96 = vector.shape_cast %95 : vector<32xf32> to vector<32x1xf32>
    %cst_38 = arith.constant 7.812500e-03 : f32
    %97 = vector.broadcast %cst_38 : f32 to vector<32x1xf32>
    %98 = arith.mulf %96, %97 : vector<32x1xf32>
    %99 = arith.mulf %94, %94 : vector<32x128xf32>
    %cst_39 = arith.constant dense<0.000000e+00> : vector<32xf32>
    %100 = vector.multi_reduction <add>, %99, %cst_39 [1] : vector<32x128xf32> to vector<32xf32>
    %101 = vector.shape_cast %100 : vector<32xf32> to vector<32x1xf32>
    %cst_40 = arith.constant 7.812500e-03 : f32
    %102 = vector.broadcast %cst_40 : f32 to vector<32x1xf32>
    %103 = arith.mulf %101, %102 : vector<32x1xf32>
    %104 = arith.mulf %98, %98 : vector<32x1xf32>
    %105 = arith.subf %103, %104 : vector<32x1xf32>
    %cst_41 = arith.constant 0.000000e+00 : f32
    %106 = vector.broadcast %cst_41 : f32 to vector<32x1xf32>
    %107 = arith.maximumf %105, %106 : vector<32x1xf32>
    %cst_42 = arith.constant 9.99999974E-6 : f32
    %108 = vector.broadcast %cst_42 : f32 to vector<32x1xf32>
    %109 = arith.addf %107, %108 : vector<32x1xf32>
    %110 = math.rsqrt %109 : vector<32x1xf32>
    %111 = vector.extract_strided_slice %3 {offsets = [0, 128], sizes = [32, 128], strides = [1, 1]} : vector<32x256xf32> to vector<32x128xf32>
    %112 = vector.broadcast %98 : vector<32x1xf32> to vector<32x128xf32>
    %113 = arith.subf %94, %112 : vector<32x128xf32>
    %114 = vector.broadcast %110 : vector<32x1xf32> to vector<32x128xf32>
    %115 = arith.mulf %113, %114 : vector<32x128xf32>
    %cst_43 = arith.constant 0.000000e+00 : f32
    %116 = vector.broadcast %cst_43 : f32 to vector<32x128xf32>
    %117 = arith.maximumf %115, %116 : vector<32x128xf32>
    %118 = arith.addf %111, %117 : vector<32x128xf32>
    %c0_44 = arith.constant 0 : index
    %c128 = arith.constant 128 : index
    %119 = vector.load %arg10[%c0_44, %c128] : memref<32x256xf32, #tpu.memory_space<vmem>>, vector<32x128xf32>
    tpu.vector_store %arg10[%c0_44, %c128], %118 {strides = array<i32>} : memref<32x256xf32, #tpu.memory_space<vmem>>, vector<32x128xf32>,
    %c1_i32 = arith.constant 1 : i32
    %120 = arith.cmpi eq, %arg1, %c1_i32 : i32
    %121 = arith.extui %120 : i1 to i32
    %c0_i32_45 = arith.constant 0 : i32
    %122 = arith.cmpi ne, %121, %c0_i32_45 : i32
    scf.if %122 {
      %c0_46 = arith.constant 0 : index
      %c0_47 = arith.constant 0 : index
      %123 = vector.load %arg10[%c0_46, %c0_47] : memref<32x256xf32, #tpu.memory_space<vmem>>, vector<32x256xf32>
      %c0_48 = arith.constant 0 : index
      %c0_49 = arith.constant 0 : index
      %124 = vector.load %arg7[%c0_48, %c0_49] : memref<32x1xf32, #tpu.memory_space<vmem>>, vector<32x1xf32>
      %125 = vector.broadcast %124 : vector<32x1xf32> to vector<32x256xf32>
      %126 = arith.mulf %123, %125 : vector<32x256xf32>
      %cst_50 = arith.constant dense<0.000000e+00> : vector<256xf32>
      %127 = vector.multi_reduction <add>, %126, %cst_50 [0] : vector<32x256xf32> to vector<256xf32>
      %128 = vector.shape_cast %127 : vector<256xf32> to vector<1x256xf32>
      %c0_51 = arith.constant 0 : index
      %c0_52 = arith.constant 0 : index
      %129 = vector.load %arg8[%c0_51, %c0_52] : memref<1x1xf32, #tpu.memory_space<vmem>>, vector<1x1xf32>
      %130 = vector.broadcast %129 : vector<1x1xf32> to vector<1x256xf32>
      %131 = arith.addf %128, %130 : vector<1x256xf32>
      %c0_53 = arith.constant 0 : index
      %c0_54 = arith.constant 0 : index
      %c0_55 = arith.constant 0 : index
      %132 = vector.load %arg9[%c0_53, %c0_54, %c0_55] : memref<1x1x256xf32, #tpu.memory_space<vmem>>, vector<1x1x256xf32>
      %133 = vector.shape_cast %132 : vector<1x1x256xf32> to vector<1x256xf32>
      %134 = vector.shape_cast %131 : vector<1x256xf32> to vector<1x1x256xf32>
      tpu.vector_store %arg9[%c0_53, %c0_54, %c0_55], %134 {strides = array<i32>} : memref<1x1x256xf32, #tpu.memory_space<vmem>>, vector<1x1x256xf32>,
    } else {
    }
    return
  }
  func.func @transform_0(%arg0: i32, %arg1: i32) -> (i32, i32, i32) {
    %c0_i32 = arith.constant 0 : i32
    %c0_i32_0 = arith.constant 0 : i32
    %c0_i32_1 = arith.constant 0 : i32
    return %arg0, %c0_i32, %c0_i32_0 : i32, i32, i32
  }
  func.func @transform_1(%arg0: i32, %arg1: i32) -> (i32, i32) {
    %c0_i32 = arith.constant 0 : i32
    %c0_i32_0 = arith.constant 0 : i32
    %c0_i32_1 = arith.constant 0 : i32
    return %c0_i32, %c0_i32_0 : i32, i32
  }
  func.func @transform_2(%arg0: i32, %arg1: i32) -> (i32, i32) {
    %c0_i32 = arith.constant 0 : i32
    %c0_i32_0 = arith.constant 0 : i32
    %c0_i32_1 = arith.constant 0 : i32
    return %c0_i32, %c0_i32_0 : i32, i32
  }
  func.func @transform_3(%arg0: i32, %arg1: i32) -> (i32, i32, i32) {
    %c0_i32 = arith.constant 0 : i32
    %c0_i32_0 = arith.constant 0 : i32
    %c0_i32_1 = arith.constant 0 : i32
    return %arg1, %c0_i32, %c0_i32_0 : i32, i32, i32
  }
  func.func @transform_4(%arg0: i32, %arg1: i32) -> (i32, i32, i32) {
    %c0_i32 = arith.constant 0 : i32
    %c0_i32_0 = arith.constant 0 : i32
    %c0_i32_1 = arith.constant 0 : i32
    return %arg1, %c0_i32, %c0_i32_0 : i32, i32, i32
  }
  func.func @transform_5(%arg0: i32, %arg1: i32) -> (i32, i32) {
    %c0_i32 = arith.constant 0 : i32
    %c0_i32_0 = arith.constant 0 : i32
    %c0_i32_1 = arith.constant 0 : i32
    return %c0_i32, %c0_i32_0 : i32, i32
  }
  func.func @transform_6(%arg0: i32, %arg1: i32) -> (i32, i32) {
    %c0_i32 = arith.constant 0 : i32
    %c0_i32_0 = arith.constant 0 : i32
    %c0_i32_1 = arith.constant 0 : i32
    return %c0_i32, %c0_i32_0 : i32, i32
  }
  func.func @transform_7(%arg0: i32, %arg1: i32) -> (i32, i32, i32) {
    %c0_i32 = arith.constant 0 : i32
    %c0_i32_0 = arith.constant 0 : i32
    %c0_i32_1 = arith.constant 0 : i32
    return %arg0, %c0_i32, %c0_i32_0 : i32, i32, i32
  }
}

</mosaic_0001>

<bundles_post_ra>
// kernel: tpu_custom_call.1
= control target key start
LH: loop header
LB: loop body
LE: loop exit
PB: predicated region body
PF: predicated region fallthrough
CT: control target
= control target key end

     0   :  { %s1779_s0 = inlined_call_operand.vmem [shape: f32[1,4,256], index: 0, kind: input, shape index: {}]   ;;  %s1780_s1 = inlined_call_operand.vmem [shape: f32[32,4], index: 1, kind: input, shape index: {}]   ;;  %s1781_s2 = inlined_call_operand.vmem [shape: f32[32,1], index: 2, kind: input, shape index: {}]   ;;  %s1782_s3 = inlined_call_operand.vmem [shape: bf16[4,32,32], index: 3, kind: input, shape index: {}]   ;;  %s1783_s4 = inlined_call_operand.vmem [shape: f32[4,32,1], index: 4, kind: input, shape index: {}]   ;;  %s1784_s5 = inlined_call_operand.vmem [shape: f32[32,1], index: 5, kind: input, shape index: {}]   ;;  %s1785_s6 = inlined_call_operand.<no memory space> [shape: f32[1,1], index: 6, kind: input, shape index: {}]   ;;  %s1786_s7 = inlined_call_operand.hbm [shape: f32[1,1,256], index: 7, kind: output, shape index: {}]  }
   0x1   :  { %v12_v0 = vstv %s1785_s6 }
   0x2   :  { %13 = vst [vmem:[#allocation3] sm:$0x1] %v12_v0 }
   0x3   :  { %14 = vsyncpa [#allocation5], 0  ;;  %s1462_s26 = smov 0   ;;  %s1464_s27 = smov 0  }
   0x4   :  { %s1466_s28 = smov 0  }
   0x5 LB: > { %s1234_s6 = sadd.s32 4294967295, %s1409_s28   ;;  %s29_s29 = sadd.s32 1, %s1405_s27  ;;  %s1409_s28 = sphi %s1466_s28, %s20_s28   ;;  %s1405_s27 = sphi %s1464_s27, %s1789_s27   ;;  %s1401_s26 = sphi %s1462_s26, %s1788_s26  }
   0x6   : > { %p30_p0 = scmp.ge.s32.totalorder %s29_s29, 2  ;;  %p1238_p1 = scmp.ge.s32.totalorder %s1409_s28, 1 }
   0x7   : > { %p276_p2 = scmp.lt.s32.totalorder %s1409_s28, 3 }
   0x8   : > { %s1791_s29 = smov (%p30_p0, %s29_s29), 0 }
   0x9   : > { %p277_p3 = pnand %p1238_p1, %p276_p2 }
   0xa   : > { %s1239_s30 = sshll.u32 (!%p277_p3), %s1401_s26, 1  ;;  %p1245_p5 = scmp.ne.s32.totalorder (!%p277_p3), %s1401_s26, 0 }
   0xb   : > { %280 = sbr.rel (%p277_p3) target bundleno = 1219 (0x4c3), region = 48  ;;  %p321_p4 = scmp.lt.s32.totalorder (!%p277_p3), %s1239_s30, 3 }
  0x12   : > { %s1793_s30 = smov (!%p321_p4, %s1239_s30), 3  ;;  %338 = sbr.rel (%p1245_p5) target bundleno = 200 (0xc8), region = 52 }
  0x13   : > { %s1267_s8 = sshll.u32 %s1793_s30, 4  ;;  %s1268_s9 = sshll.u32 %s1793_s30, 5  ;;  %v342_v1 = vld [vmem:[%s1780_s1 + $0x10] sm:$0xff] (!%p1245_p5)  ;;  %v340_v2 = vld [vmem:[%s1780_s1] sm:$0xff] (!%p1245_p5)  ;;  %v1411_v3 = vmov (!%p1245_p5), 0   ;;  %v343_v4 = vld [vmem:[%s1780_s1 + $0x18] sm:$0xff] (!%p1245_p5)  ;;  %v365_v17 = vlaneseq (!%p1245_p5) }
  0x14   : > { %s1487_s12 = scalar_lea.vmem %s1782_s3, %s1267_s8  ;;  %s1492_s15 = scalar_lea.vmem %s1783_s4, %s1268_s9  ;;  %1308 = vset.pattern.permute.xlu1 (!%p1245_p5), %v1411_v3  ;;  %1307 = vset.pattern.permute.xlu0 (!%p1245_p5), %v1411_v3  ;;  %v341_v5 = vld [vmem:[%s1780_s1 + $0x8] sm:$0xff] (!%p1245_p5)  ;;  %v1412_v6 = vmov (!%p1245_p5), 1   ;;  %v1413_v7 = vmov (!%p1245_p5), 2   ;;  %v1414_v8 = vmov (!%p1245_p5), 3   ;;  %v541_v10 = vld [vmem:[%s1781_s2] sm:$0xff] (!%p1245_p5)  ;;  %v543_v11 = vld [vmem:[%s1781_s2 + $0x10] sm:$0xff] (!%p1245_p5) }
  0x15   : > { %356 = vperm.xlu1 (!%p1245_p5), %1308, %v342_v1   ;;  %346 = vperm.xlu0 (!%p1245_p5), %1307, %v340_v2   ;;  %v542_v9 = vld [vmem:[%s1781_s2 + $0x8] sm:$0xff] (!%p1245_p5)  ;;  %v544_v12 = vld [vmem:[%s1781_s2 + $0x18] sm:$0xff] (!%p1245_p5)  ;;  %v366_v20 = vshrl.u32 (!%p1245_p5), %v365_v17, 7  ;;  %v339_v29 = vld [vmem:[%s1779_s0] sm:$0xff] (!%p1245_p5) }
  0x17   : > { %v409_v23 = vsub.s32 (!%p1245_p5), 1, %v366_v20  ;;  %v413_v24 = vsub.s32 (!%p1245_p5), 5, %v366_v20  ;;  %v367_v25 = vsub.s32 (!%p1245_p5), 0, %v366_v20  ;;  %v371_v26 = vsub.s32 (!%p1245_p5), 4, %v366_v20 }
  0x18   : > { %v459_v27 = vsub.s32 (!%p1245_p5), 2, %v366_v20  ;;  %v463_v28 = vsub.s32 (!%p1245_p5), 6, %v366_v20  ;;  %v509_v38 = vsub.s32 (!%p1245_p5), 3, %v366_v20  ;;  %v513_v39 = vsub.s32 (!%p1245_p5), 7, %v366_v20 }
  0x19   : > { %361 = vperm.xlu1 %1308, %v343_v4   ;;  %351 = vperm.xlu0 %1307, %v341_v5   ;;  %v410_v30 = vrot.slane %v339_v29, %v409_v23  ;;  %v414_v31 = vrot.slane %v339_v29, %v413_v24  ;;  %v368_v34 = vrot.slane %v339_v29, %v367_v25 }
  0x1a   : > { %v372_v35 = vrot.slane %v339_v29, %v371_v26  ;;  %v460_v36 = vrot.slane %v339_v29, %v459_v27  ;;  %v464_v37 = vrot.slane %v339_v29, %v463_v28  ;;  %v510_v48 = vrot.slane %v339_v29, %v509_v38 }
  0x1b   : > { %v420_v40 = vrot.slane %v410_v30, %v409_v23  ;;  %v424_v41 = vrot.slane %v414_v31, %v409_v23  ;;  %v378_v44 = vrot.slane %v368_v34, %v367_v25  ;;  %v514_v49 = vrot.slane %v339_v29, %v513_v39 }
  0x1c   : > { %v382_v45 = vrot.slane %v372_v35, %v367_v25  ;;  %v470_v46 = vrot.slane %v460_v36, %v459_v27  ;;  %v474_v47 = vrot.slane %v464_v37, %v459_v27  ;;  %v520_v0 = vrot.slane %v510_v48, %v509_v38 }
  0x1d   : > { %1310 = vset.pattern.permute.xlu1 %v1412_v6  ;;  %1309 = vset.pattern.permute.xlu0 %v1412_v6 }
  0x1e   : > { %396 = vperm.xlu1 %1310, %v341_v5   ;;  %392 = vperm.xlu0 %1309, %v340_v2  }
  0x22   : > { %400 = vperm.xlu1 %1310, %v342_v1   ;;  %404 = vperm.xlu0 %1309, %v343_v4  }
  0x26   : > { %1311 = vset.pattern.permute.xlu1 %v1413_v7  ;;  %1312 = vset.pattern.permute.xlu0 %v1413_v7 }
  0x27   : > { %442 = vperm.xlu1 %1311, %v340_v2   ;;  %446 = vperm.xlu0 %1312, %v341_v5  }
  0x2b   : > { %450 = vperm.xlu1 %1311, %v342_v1   ;;  %1313 = vset.pattern.permute.xlu0 %v1414_v8 }
  0x2c   : > { %492 = vperm.xlu0 %1313, %v340_v2  }
  0x2f   : > { %454 = vperm.xlu1 %1311, %v343_v4  }
  0x30   : > { %504 = vperm.xlu0 %1313, %v343_v4  }
  0x33   : > { %1314 = vset.pattern.permute.xlu1 %v1414_v8 }
  0x34   : > { %496 = vperm.xlu1 %1314, %v341_v5   ;;  %1316 = vset.pattern.permute.xlu0 %v1411_v3 }
  0x35   : > { %552 = vperm.xlu0 %1316, %v542_v9  }
  0x38   : > { %500 = vperm.xlu1 %1314, %v342_v1   ;;  %v524_v1 = vrot.slane %v514_v49, %v509_v38 }
  0x3c   : > { %1315 = vset.pattern.permute.xlu1 %v1411_v3 }
  0x3d   : > { %547 = vperm.xlu1 %1315, %v541_v10  }
  0x41   : > { %557 = vperm.xlu1 %1315, %v543_v11  }
  0x45   : > { %562 = vperm.xlu1 %1315, %v544_v12  }
  0x94   : > { %v1519_v13 = vpop.permute.xlu1 %356  ;;  %v347_v14 = vpop.permute.xlu0 %346 }
  0x95   : > { %v383_v55 = vmul.f32 %v378_v44, %v347_v14  ;;  %v384_v56 = vmul.f32 %v382_v45, %v347_v14  ;;  %v387_v20 = vmul.f32 %v378_v44, %v1519_v13  ;;  %v388_v23 = vmul.f32 %v382_v45, %v1519_v13 }
  0x98   : > { %v1521_v15 = vpop.permute.xlu1 %361  ;;  %v352_v16 = vpop.permute.xlu0 %351 }
  0x99   : > { %v385_v50 = vmul.f32 %v378_v44, %v352_v16  ;;  %v386_v51 = vmul.f32 %v382_v45, %v352_v16  ;;  %v390_v31 = vmul.f32 %v382_v45, %v1521_v15 }
  0x9d   : > { %v397_v18 = vpop.permute.xlu1 %396  ;;  %v393_v19 = vpop.permute.xlu0 %392 }
  0x9e   : > { %v427_v52 = vmul.f32 %v420_v40, %v397_v18  ;;  %v428_v53 = vmul.f32 %v424_v41, %v397_v18  ;;  %v425_v57 = vmul.f32 %v420_v40, %v393_v19  ;;  %v426_v58 = vmul.f32 %v424_v41, %v393_v19 }
  0xa0   : > { %v435_v62 = vadd.f32 %v427_v52, %v385_v50  ;;  %v436_v63 = vadd.f32 %v428_v53, %v386_v51  ;;  %v433_v2 = vadd.f32 %v425_v57, %v383_v55  ;;  %v434_v3 = vadd.f32 %v426_v58, %v384_v56 }
  0xa1   : > { %v401_v21 = vpop.permute.xlu1 %400  ;;  %v1523_v22 = vpop.permute.xlu0 %404 }
  0xa2   : > { %v429_v11 = vmul.f32 %v420_v40, %v401_v21  ;;  %v430_v12 = vmul.f32 %v424_v41, %v401_v21  ;;  %v431_v24 = vmul.f32 %v420_v40, %v1523_v22  ;;  %v432_v25 = vmul.f32 %v424_v41, %v1523_v22 }
  0xa3   : > { %v389_v21 = vmul.f32 %v378_v44, %v1521_v15 }
  0xa4   : > { %v437_v34 = vadd.f32 %v429_v11, %v387_v20  ;;  %v438_v35 = vadd.f32 %v430_v12, %v388_v23  ;;  %v440_v41 = vadd.f32 %v432_v25, %v390_v31 }
  0xa5   : > { %v439_v40 = vadd.f32 %v431_v24, %v389_v21 }
  0xa6   : > { %v443_v32 = vpop.permute.xlu1 %442  ;;  %v447_v33 = vpop.permute.xlu0 %446 }
  0xa7   : > { %v477_v59 = vmul.f32 %v470_v46, %v447_v33  ;;  %v478_v60 = vmul.f32 %v474_v47, %v447_v33  ;;  %v475_v4 = vmul.f32 %v470_v46, %v443_v32  ;;  %v476_v5 = vmul.f32 %v474_v47, %v443_v32 }
  0xa9   : > { %v485_v7 = vadd.f32 %v477_v59, %v435_v62  ;;  %v486_v8 = vadd.f32 %v478_v60, %v436_v63  ;;  %v483_v27 = vadd.f32 %v475_v4, %v433_v2  ;;  %v484_v28 = vadd.f32 %v476_v5, %v434_v3 }
  0xaa   : > { %v451_v42 = vpop.permute.xlu1 %450 }
  0xab   : > { %v493_v43 = vpop.permute.xlu0 %492  ;;  %v479_v32 = vmul.f32 %v470_v46, %v451_v42  ;;  %v480_v33 = vmul.f32 %v474_v47, %v451_v42 }
  0xac   : > { %v525_v16 = vmul.f32 %v520_v0, %v493_v43  ;;  %v526_v17 = vmul.f32 %v524_v1, %v493_v43 }
  0xad   : > { %v487_v48 = vadd.f32 %v479_v32, %v437_v34  ;;  %v488_v49 = vadd.f32 %v480_v33, %v438_v35 }
  0xae   : > { %v455_v54 = vpop.permute.xlu1 %454  ;;  %v533_v13 = vadd.f32 %v525_v16, %v483_v27  ;;  %v534_v36 = vadd.f32 %v526_v17, %v484_v28 }
  0xaf   : > { %v505_v61 = vpop.permute.xlu0 %504  ;;  %v481_v37 = vmul.f32 %v470_v46, %v455_v54  ;;  %v482_v38 = vmul.f32 %v474_v47, %v455_v54 }
  0xb0   : > { %v531_v15 = vmul.f32 %v520_v0, %v505_v61  ;;  %v532_v45 = vmul.f32 %v524_v1, %v505_v61 }
  0xb1   : > { %v489_v42 = vadd.f32 %v481_v37, %v439_v40  ;;  %v490_v51 = vadd.f32 %v482_v38, %v440_v41 }
  0xb3   : > { %v497_v6 = vpop.permute.xlu1 %496  ;;  %v539_v54 = vadd.f32 %v531_v15, %v489_v42  ;;  %v540_v56 = vadd.f32 %v532_v45, %v490_v51 }
  0xb4   : > { %v527_v9 = vmul.f32 %v520_v0, %v497_v6  ;;  %v528_v10 = vmul.f32 %v524_v1, %v497_v6  ;;  %v553_v14 = vpop.permute.xlu0 %552 }
  0xb6   : > { %v535_v18 = vadd.f32 %v527_v9, %v485_v7  ;;  %v536_v19 = vadd.f32 %v528_v10, %v486_v8 }
  0xb7   : > { %v501_v26 = vpop.permute.xlu1 %500 }
  0xb8   : > { %v567_v29 = vadd.f32 %v553_v14, %v535_v18  ;;  %v568_v30 = vadd.f32 %v553_v14, %v536_v19  ;;  %v529_v22 = vmul.f32 %v520_v0, %v501_v26  ;;  %v530_v39 = vmul.f32 %v524_v1, %v501_v26 }
  0xba   : > { %575 = vst [vmem:[#allocation2 + $0x10] sm:$0xff] %v567_v29  ;;  %576 = vst [vmem:[#allocation2 + $0x18] sm:$0xff] %v568_v30  ;;  %v537_v52 = vadd.f32 %v529_v22, %v487_v48  ;;  %v538_v53 = vadd.f32 %v530_v39, %v488_v49 }
  0xbc   : > { %v548_v43 = vpop.permute.xlu1 %547 }
  0xbd   : > { %v565_v44 = vadd.f32 %v548_v43, %v533_v13  ;;  %v566_v50 = vadd.f32 %v548_v43, %v534_v36 }
  0xbf   : > { %573 = vst [vmem:[#allocation2] sm:$0xff] %v565_v44  ;;  %574 = vst [vmem:[#allocation2 + $0x8] sm:$0xff] %v566_v50 }
  0xc0   : > { %v558_v55 = vpop.permute.xlu1 %557 }
  0xc1   : > { %v569_v46 = vadd.f32 %v558_v55, %v537_v52  ;;  %v570_v47 = vadd.f32 %v558_v55, %v538_v53 }
  0xc3   : > { %577 = vst [vmem:[#allocation2 + $0x20] sm:$0xff] %v569_v46  ;;  %578 = vst [vmem:[#allocation2 + $0x28] sm:$0xff] %v570_v47 }
  0xc4   : > { %v563_v57 = vpop.permute.xlu1 %562 }
  0xc5   : > { %v571_v58 = vadd.f32 %v563_v57, %v539_v54  ;;  %v572_v59 = vadd.f32 %v563_v57, %v540_v56 }
  0xc7   : > { %579 = vst [vmem:[#allocation2 + $0x30] sm:$0xff] %v571_v58  ;;  %580 = vst [vmem:[#allocation2 + $0x38] sm:$0xff] %v572_v59 }
  0xc8 PF: > { %v1534_v60 = vld [vmem:[#allocation2 + $0x8] sm:$0xff]  ;;  %v1536_v61 = vld [vmem:[#allocation2 + $0x18] sm:$0xff]  ;;  %v1538_v62 = vld [vmem:[#allocation2] sm:$0xff]  ;;  %v1415_v3 = vmov 0   ;;  %vm631_vm0 = vcmask 261120   ;;  %p1262_p6 = scmp.ne.s32.totalorder %s1401_s26, 1 }
  0xc9   : > { %v594_v63 = vpack.c.bf16 %v1536_v61, %v1534_v60  ;;  %v1542_v0 = vld [vmem:[#allocation2 + $0x10] sm:$0xff]  ;;  %670 = vmatprep.mubr.bf16.mxu0 %v1415_v3  ;;  %1317 = vset.pattern.permute.xlu0 %v1415_v3  ;;  %v597_v9 = vld [vmem:[%s1492_s15] sm:$0xff]  ;;  %v598_v10 = vld [vmem:[%s1492_s15 + $0x8] sm:$0xff] }
  0xca   : > { %v1544_v1 = vld [vmem:[#allocation2 + $0x28] sm:$0xff]  ;;  %v593_v4 = vpack.c.bf16 %v1542_v0, %v1538_v62  ;;  %v1554_v6 = vld [vmem:[#allocation2 + $0x20] sm:$0xff]  ;;  %1318 = vset.pattern.permute.xlu1 %v1415_v3  ;;  %893 = vmatprep.mubr.bf16.mxu1 %v1415_v3  ;;  %v599_v11 = vld [vmem:[%s1492_s15 + $0x10] sm:$0xff] }
  0xcb   : > { %638 = vmatprep.subr.bf16.mxu0 %v594_v63  ;;  %603 = vperm.xlu0 %1317, %v597_v9   ;;  %v1319_v12 = vld [vmem:[%s1487_s12] sm:$0xff]   ;;  %v600_v14 = vld [vmem:[%s1492_s15 + $0x18] sm:$0xff]  ;;  %v1320_v16 = vld [vmem:[%s1487_s12 + $0x8] sm:$0xff]  }
  0xcc   : > { %639 = vmatpush1.bf16.msra.mxu0 %v593_v4  ;;  %613 = vperm.xlu1 %1318, %v599_v11   ;;  %v1254_v49 = vld [vmem:[%s1492_s15 + $0x20] sm:$0xff]  ;;  %v1256_v44 = vld [vmem:[%s1492_s15 + $0x30] sm:$0xff]  ;;  %v1257_v50 = vld [vmem:[%s1492_s15 + $0x38] sm:$0xff] }
  0xcd   : > { %v1255_v15 = vld [vmem:[%s1492_s15 + $0x28] sm:$0xff] }
  0xce   : > { %v1546_v2 = vld [vmem:[#allocation2 + $0x38] sm:$0xff]  ;;  %v1556_v7 = vld [vmem:[#allocation2 + $0x30] sm:$0xff] }
  0xcf   : > { %v596_v5 = vpack.c.bf16 %v1546_v2, %v1544_v1  ;;  %v595_v8 = vpack.c.bf16 %v1556_v7, %v1554_v6  ;;  %608 = vperm.xlu0 %1317, %v598_v10  }
  0xd0   : > { %618 = vperm.xlu1 %1318, %v600_v14  }
  0xd1   : > { %640 = vmatprep.subr.bf16.mxu0 %v596_v5 }
  0xd2   : > { %641 = vmatpush1.bf16.msra.mxu0 %v595_v8 }
  0xd5   : > { %1248 = vmatmul.mubr.msk.bf16.vlgmr.msra.gmra.mrb[0].mxu0 %vm631_vm0, %v1319_v12 }
  0xd6   : > { %680 = vmatprep.mubr.bf16.mxu0 %v1415_v3 }
  0xdd   : > { %1249 = vmatmul.mubr.msk.bf16.gmra.mrb[4].mxu0 %vm631_vm0, %v1320_v16 }
 0x14a   : > { %v604_v17 = vpop.permute.xlu0 %603 }
 0x14b   : > { %v614_v34 = vpop.permute.xlu1 %613 }
 0x14e   : > { %v609_v27 = vpop.permute.xlu0 %608 }
 0x14f   : > { %v619_v37 = vpop.permute.xlu1 %618 }
 0x1a8   : > { %v672_v18 = vpop.f32.mrb[0].mxu0 }
 0x1a9   : > { %v1571_v19 = vadd.f32 %v672_v18, %v604_v17  ;;  %v674_v20 = vpop.f32.mrb[1].mxu0 }
 0x1aa   : > { %v676_v23 = vpop.f32.mrb[2].mxu0  ;;  %v1576_v26 = vadd.f32 %v674_v20, %v604_v17 }
 0x1ab   : > { %v678_v24 = vpop.f32.mrb[3].mxu0  ;;  %691 = vadd.xlane.f32.xlu0 %v1571_v19  ;;  %v703_v25 = vmul.f32 %v1571_v19, %v1571_v19  ;;  %v1581_v30 = vadd.f32 %v676_v23, %v609_v27 }
 0x1ac   : > { %v1578_v28 = vadd.f32 %v678_v24, %v609_v27  ;;  %v765_v32 = vmul.f32 %v1576_v26, %v1576_v26 }
 0x1ad   : > { %707 = vadd.xlane.f32.xlu1 %v703_v25  ;;  %v704_v13 = vmul.f32 %v1581_v30, %v1581_v30 }
 0x1ae   : > { %v766_v36 = vmul.f32 %v1578_v28, %v1578_v28 }
 0x1af   : > { %753 = vadd.xlane.f32.xlu0 %v1576_v26 }
 0x1b0   : > { %v682_v29 = vpop.f32.mrb[4].mxu0 }
 0x1b1   : > { %755 = vadd.xlane.f32.xlu1 %v1578_v28  ;;  %v684_v21 = vpop.f32.mrb[5].mxu0  ;;  %v1587_v35 = vadd.f32 %v682_v29, %v614_v34 }
 0x1b2   : > { %v686_v31 = vpop.f32.mrb[6].mxu0  ;;  %v1594_v38 = vadd.f32 %v684_v21, %v614_v34 }
 0x1b3   : > { %693 = vadd.xlane.f32.xlu0 %v1581_v30  ;;  %v688_v33 = vpop.f32.mrb[7].mxu0  ;;  %v1596_v22 = vadd.f32 %v686_v31, %v619_v37  ;;  %v705_v41 = vmul.f32 %v1587_v35, %v1587_v35 }
 0x1b4   : > { %v767_v39 = vmul.f32 %v1594_v38, %v1594_v38  ;;  %v1602_v40 = vadd.f32 %v688_v33, %v619_v37 }
 0x1b5   : > { %769 = vadd.xlane.f32.xlu1 %v765_v32  ;;  %v706_v48 = vmul.f32 %v1596_v22, %v1596_v22 }
 0x1b6   : > { %v768_v43 = vmul.f32 %v1602_v40, %v1602_v40 }
 0x1b7   : > { %709 = vadd.xlane.f32.xlu0 %v704_v13 }
 0x1b9   : > { %695 = vadd.xlane.f32.xlu1 %v1587_v35 }
 0x1bb   : > { %771 = vadd.xlane.f32.xlu0 %v766_v36 }
 0x1bd   : > { %757 = vadd.xlane.f32.xlu1 %v1594_v38 }
 0x1bf   : > { %697 = vadd.xlane.f32.xlu0 %v1596_v22 }
 0x1c1   : > { %773 = vadd.xlane.f32.xlu1 %v767_v39 }
 0x1c3   : > { %759 = vadd.xlane.f32.xlu0 %v1602_v40 }
 0x1c5   : > { %711 = vadd.xlane.f32.xlu1 %v705_v41 }
 0x1c7   : > { %775 = vadd.xlane.f32.xlu0 %v768_v43 }
 0x1cb   : > { %713 = vadd.xlane.f32.xlu0 %v706_v48 }
 0x1d6   : > { %827 = vperm.xlu1 %1318, %v1254_v49  }
 0x1da   : > { %837 = vperm.xlu1 %1318, %v1256_v44  }
 0x1de   : > { %842 = vperm.xlu1 %1318, %v1257_v50  }
 0x1e1   : > { %832 = vperm.xlu0 %1317, %v1255_v15  }
 0x238   : > { %v692_v45 = vpop.xlane.xlu0 %691 }
 0x239   : > { %v1615_v51 = vmul.f32 0.0078125, %v692_v45 }
 0x23a   : > { %v708_v42 = vpop.xlane.xlu1 %707 }
 0x23b   : > { %v719_v55 = vmul.f32 %v1615_v51, %v1615_v51  ;;  %v715_v46 = vmul.f32 0.0078125, %v708_v42 }
 0x23c   : > { %v754_v52 = vpop.xlane.xlu0 %753 }
 0x23d   : > { %v1619_v47 = vmul.f32 0.0078125, %v754_v52  ;;  %v723_v58 = vsub.f32 %v715_v46, %v719_v55 }
 0x23e   : > { %v756_v53 = vpop.xlane.xlu1 %755 }
 0x23f   : > { %v781_v59 = vmul.f32 %v1619_v47, %v1619_v47  ;;  %v1627_v10 = vmul.f32 0.0078125, %v756_v53  ;;  %v727_v12 = vmax.f32 %v723_v58, 0.0 }
 0x240   : > { %v694_v54 = vpop.xlane.xlu0 %693 }
 0x241   : > { %v1621_v56 = vmul.f32 0.0078125, %v694_v54  ;;  %v782_v20 = vmul.f32 %v1627_v10, %v1627_v10  ;;  %v731_v27 = vadd.f32 1e-05, %v727_v12 }
 0x242   : > { %v770_v57 = vpop.xlane.xlu1 %769 }
 0x243   : > { %v777_v63 = vmul.f32 0.0078125, %v770_v57  ;;  %v720_v5 = vmul.f32 %v1621_v56, %v1621_v56 }
 0x244   : > { %v710_v4 = vpop.xlane.xlu0 %709 }
 0x245   : > { %v785_v8 = vsub.f32 %v777_v63, %v781_v59  ;;  %v716_v9 = vmul.f32 0.0078125, %v710_v4  ;;  %v801_v63 = vsub.f32 %v1576_v26, %v1619_v47  ;;  %v740_v4 = vsub.f32 %v1581_v30, %v1621_v56 }
 0x246   : > { %v696_v11 = vpop.xlane.xlu1 %695 }
 0x247   : > { %v789_v14 = vmax.f32 %v785_v8, 0.0  ;;  %v724_v16 = vsub.f32 %v716_v9, %v720_v5  ;;  %v701_v41 = vmul.f32 0.0078125, %v696_v11 }
 0x248   : > { %v772_v17 = vpop.xlane.xlu0 %771 }
 0x249   : > { %v728_v18 = vmax.f32 %v724_v16, 0.0  ;;  %v793_v23 = vadd.f32 1e-05, %v789_v14  ;;  %v778_v24 = vmul.f32 0.0078125, %v772_v17  ;;  %v721_v44 = vmul.f32 %v701_v41, %v701_v41 }
 0x24a   : > { %v758_v25 = vpop.xlane.xlu1 %757  ;;  %v739_v16 = vsub.f32 %v1571_v19, %v1615_v51 }
 0x24b   : > { %v732_v29 = vadd.f32 1e-05, %v728_v18  ;;  %v1631_v21 = vmul.f32 0.0078125, %v758_v25  ;;  %v786_v31 = vsub.f32 %v778_v24, %v782_v20  ;;  %v802_v18 = vsub.f32 %v1578_v28, %v1627_v10 }
 0x24c   : > { %v698_v32 = vpop.xlane.xlu0 %697 }
 0x24d   : > { %1323 = vrsqrt.f32 %v732_v29  ;;  %v790_v33 = vmax.f32 %v786_v31, 0.0  ;;  %v783_v13 = vmul.f32 %v1631_v21, %v1631_v21  ;;  %v702_v45 = vmul.f32 0.0078125, %v698_v32 }
 0x24e   : > { %1325 = vrsqrt.f32 %v793_v23  ;;  %v774_v34 = vpop.xlane.xlu1 %773  ;;  %v803_v28 = vsub.f32 %v1594_v38, %v1631_v21 }
 0x24f   : > { %1327 = vrsqrt.f32 %v731_v27  ;;  %v779_v36 = vmul.f32 0.0078125, %v774_v34  ;;  %v794_v37 = vadd.f32 1e-05, %v790_v33  ;;  %v722_v5 = vmul.f32 %v702_v45, %v702_v45 }
 0x250   : > { %v760_v39 = vpop.xlane.xlu0 %759 }
 0x251   : > { %v787_v43 = vsub.f32 %v779_v36, %v783_v13  ;;  %v764_v48 = vmul.f32 0.0078125, %v760_v39  ;;  %1329 = vrsqrt.f32 %v794_v37  ;;  %v741_v37 = vsub.f32 %v1587_v35, %v701_v41  ;;  %v1322_v35 = vld [vmem:[%s1487_s12 + $0x18] sm:$0xff]  }
 0x252   : > { %v712_v49 = vpop.xlane.xlu1 %711 }
 0x253   : > { %v791_v50 = vmax.f32 %v787_v43, 0.0  ;;  %v717_v15 = vmul.f32 0.0078125, %v712_v49  ;;  %v784_v53 = vmul.f32 %v764_v48, %v764_v48  ;;  %v804_v34 = vsub.f32 %v1602_v40, %v764_v48  ;;  %v1321_v40 = vld [vmem:[%s1487_s12 + $0x10] sm:$0xff]  }
 0x254   : > { %v776_v42 = vpop.xlane.xlu0 %775  ;;  %v742_v43 = vsub.f32 %v1596_v22, %v702_v45 }
 0x255   : > { %v795_v52 = vadd.f32 1e-05, %v791_v50  ;;  %v725_v55 = vsub.f32 %v717_v15, %v721_v44  ;;  %v780_v46 = vmul.f32 0.0078125, %v776_v42 }
 0x256   : > { %v828_v22 = vpop.permute.xlu1 %827 }
 0x257   : > { %v1324_v54 = vpop.eup %1323  ;;  %v729_v57 = vmax.f32 %v725_v55, 0.0  ;;  %v788_v58 = vsub.f32 %v780_v46, %v784_v53  ;;  %1331 = vrsqrt.f32 %v795_v52 }
 0x258   : > { %v1326_v59 = vpop.eup %1325  ;;  %v714_v8 = vpop.xlane.xlu0 %713  ;;  %v744_v17 = vmul.f32 %v1324_v54, %v740_v4 }
 0x259   : > { %v1328_v9 = vpop.eup %1327  ;;  %v733_v11 = vadd.f32 1e-05, %v729_v57  ;;  %v792_v12 = vmax.f32 %v788_v58, 0.0  ;;  %v718_v14 = vmul.f32 0.0078125, %v714_v8  ;;  %v805_v26 = vmul.f32 %v1326_v59, %v801_v63 }
 0x25a   : > { %v743_v30 = vmul.f32 %v1328_v9, %v739_v16  ;;  %v748_v25 = vmax.f32 %v744_v17, 0.0 }
 0x25b   : > { %v796_v20 = vadd.f32 1e-05, %v792_v12  ;;  %v726_v23 = vsub.f32 %v718_v14, %v722_v5  ;;  %v1330_v47 = vpop.eup %1329  ;;  %1333 = vrsqrt.f32 %v733_v11  ;;  %v809_v29 = vmax.f32 %v805_v26, 0.0  ;;  %v838_v12 = vpop.permute.xlu1 %837 }
 0x25c   : > { %v806_v24 = vmul.f32 %v1330_v47, %v802_v18  ;;  %v747_v32 = vmax.f32 %v743_v30, 0.0 }
 0x25d   : > { %1335 = vrsqrt.f32 %v796_v20  ;;  %v730_v56 = vmax.f32 %v726_v23, 0.0 }
 0x25e   : > { %v810_v31 = vmax.f32 %v806_v24, 0.0  ;;  %v751_v51 = vpack.c.bf16 %v748_v25, %v747_v32 }
 0x25f   : > { %v734_v27 = vadd.f32 1e-05, %v730_v56  ;;  %v843_v18 = vpop.permute.xlu1 %842 }
 0x260   : > { %v813_v19 = vpack.c.bf16 %v810_v31, %v809_v29  ;;  %v833_v54 = vpop.permute.xlu0 %832 }
 0x261   : > { %1337 = vrsqrt.f32 %v734_v27  ;;  %v1332_v33 = vpop.eup %1331 }
 0x262   : > { %861 = vmatprep.subr.bf16.mxu1 %v813_v19  ;;  %v807_v13 = vmul.f32 %v1332_v33, %v803_v28 }
 0x263   : > { %862 = vmatpush1.bf16.msra.mxu1 %v751_v51 }
 0x264   : > { %v811_v49 = vmax.f32 %v807_v13, 0.0 }
 0x265   : > { %v1334_v10 = vpop.eup %1333 }
 0x266   : > { %v745_v50 = vmul.f32 %v1334_v10, %v741_v37 }
 0x267   : > { %v1336_v36 = vpop.eup %1335 }
 0x268   : > { %v808_v39 = vmul.f32 %v1336_v36, %v804_v34  ;;  %v749_v38 = vmax.f32 %v745_v50, 0.0 }
 0x26a   : > { %v812_v44 = vmax.f32 %v808_v39, 0.0 }
 0x26b   : > { %v1338_v15 = vpop.eup %1337 }
 0x26c   : > { %v814_v42 = vpack.c.bf16 %v812_v44, %v811_v49  ;;  %v746_v52 = vmul.f32 %v1338_v15, %v742_v43 }
 0x26e   : > { %863 = vmatprep.subr.bf16.mxu1 %v814_v42  ;;  %v750_v21 = vmax.f32 %v746_v52, 0.0 }
 0x270   : > { %v752_v53 = vpack.c.bf16 %v750_v21, %v749_v38 }
 0x272   : > { %864 = vmatpush1.bf16.msra.mxu1 %v752_v53 }
 0x275   : > { %1260 = vmatmul.mubr.msk.bf16.vlgmr.msra.gmra.mrb[0].mxu1 %vm631_vm0, %v1321_v40 }
 0x276   : > { %903 = vmatprep.mubr.bf16.mxu1 %v1415_v3 }
 0x27d   : > { %1261 = vmatmul.mubr.msk.bf16.gmra.mrb[4].mxu1 %vm631_vm0, %v1322_v35 }
 0x348   : > { %v895_v41 = vpop.f32.mrb[0].mxu1 }
 0x349   : > { %v1653_v48 = vadd.f32 %v895_v41, %v828_v22  ;;  %v897_v45 = vpop.f32.mrb[1].mxu1 }
 0x34a   : > { %v1655_v55 = vadd.f32 %v897_v45, %v828_v22  ;;  %v899_v46 = vpop.f32.mrb[2].mxu1 }
 0x34b   : > { %v901_v57 = vpop.f32.mrb[3].mxu1  ;;  %914 = vadd.xlane.f32.xlu0 %v1653_v48  ;;  %v1661_v3 = vadd.f32 %v899_v46, %v833_v54  ;;  %v926_v8 = vmul.f32 %v1653_v48, %v1653_v48 }
 0x34c   : > { %v1658_v58 = vadd.f32 %v901_v57, %v833_v54  ;;  %982 = vadd.xlane.f32.xlu1 %v1655_v55  ;;  %v994_v14 = vmul.f32 %v1655_v55, %v1655_v55 }
 0x34d   : > { %v927_v4 = vmul.f32 %v1661_v3, %v1661_v3 }
 0x34e   : > { %v995_v11 = vmul.f32 %v1658_v58, %v1658_v58 }
 0x34f   : > { %984 = vadd.xlane.f32.xlu0 %v1658_v58 }
 0x350   : > { %v905_v59 = vpop.f32.mrb[4].mxu1  ;;  %916 = vadd.xlane.f32.xlu1 %v1661_v3 }
 0x351   : > { %v907_v63 = vpop.f32.mrb[5].mxu1  ;;  %v1673_v16 = vadd.f32 %v905_v59, %v838_v12 }
 0x352   : > { %v909_v5 = vpop.f32.mrb[6].mxu1  ;;  %v1675_v17 = vadd.f32 %v907_v63, %v838_v12 }
 0x353   : > { %v911_v9 = vpop.f32.mrb[7].mxu1  ;;  %932 = vadd.xlane.f32.xlu0 %v927_v4  ;;  %v1679_v20 = vadd.f32 %v909_v5, %v843_v18  ;;  %v928_v23 = vmul.f32 %v1673_v16, %v1673_v16 }
 0x354   : > { %930 = vadd.xlane.f32.xlu1 %v926_v8  ;;  %v1684_v26 = vadd.f32 %v911_v9, %v843_v18  ;;  %v996_v47 = vmul.f32 %v1675_v17, %v1675_v17 }
 0x355   : > { %v929_v30 = vmul.f32 %v1679_v20, %v1679_v20 }
 0x356   : > { %v997_v56 = vmul.f32 %v1684_v26, %v1684_v26 }
 0x357   : > { %1000 = vadd.xlane.f32.xlu0 %v995_v11 }
 0x358   : > { %998 = vadd.xlane.f32.xlu1 %v994_v14 }
 0x35b   : > { %918 = vadd.xlane.f32.xlu0 %v1673_v16 }
 0x35c   : > { %986 = vadd.xlane.f32.xlu1 %v1675_v17 }
 0x35f   : > { %920 = vadd.xlane.f32.xlu0 %v1679_v20 }
 0x360   : > { %934 = vadd.xlane.f32.xlu1 %v928_v23 }
 0x363   : > { %988 = vadd.xlane.f32.xlu0 %v1684_v26 }
 0x364   : > { %1002 = vadd.xlane.f32.xlu1 %v996_v47 }
 0x367   : > { %936 = vadd.xlane.f32.xlu0 %v929_v30 }
 0x36b   : > { %1004 = vadd.xlane.f32.xlu0 %v997_v56 }
 0x3d8   : > { %v915_v24 = vpop.xlane.xlu0 %914 }
 0x3d9   : > { %v983_v25 = vpop.xlane.xlu1 %982  ;;  %v922_v31 = vmul.f32 0.0078125, %v915_v24 }
 0x3da   : > { %v1695_v13 = vmul.f32 0.0078125, %v983_v25 }
 0x3db   : > { %v942_v34 = vmul.f32 %v922_v31, %v922_v31  ;;  %v962_v25 = vsub.f32 %v1653_v48, %v922_v31 }
 0x3dc   : > { %v985_v27 = vpop.xlane.xlu0 %984  ;;  %v1010_v42 = vmul.f32 %v1695_v13, %v1695_v13  ;;  %v1030_v48 = vsub.f32 %v1655_v55, %v1695_v13 }
 0x3dd   : > { %v917_v29 = vpop.xlane.xlu1 %916  ;;  %v1693_v33 = vmul.f32 0.0078125, %v985_v27 }
 0x3de   : > { %v923_v32 = vmul.f32 0.0078125, %v917_v29 }
 0x3df   : > { %v1011_v49 = vmul.f32 %v1693_v33, %v1693_v33 }
 0x3e0   : > { %v943_v19 = vmul.f32 %v923_v32, %v923_v32  ;;  %v933_v51 = vpop.xlane.xlu0 %932  ;;  %v963_v23 = vsub.f32 %v1661_v3, %v923_v32  ;;  %v1031_v3 = vsub.f32 %v1658_v58, %v1693_v33 }
 0x3e1   : > { %v939_v28 = vmul.f32 0.0078125, %v933_v51  ;;  %v931_v10 = vpop.xlane.xlu1 %930 }
 0x3e2   : > { %v938_v36 = vmul.f32 0.0078125, %v931_v10 }
 0x3e3   : > { %v947_v37 = vsub.f32 %v939_v28, %v943_v19 }
 0x3e4   : > { %v946_v39 = vsub.f32 %v938_v36, %v942_v34  ;;  %v1001_v43 = vpop.xlane.xlu0 %1000 }
 0x3e5   : > { %v951_v44 = vmax.f32 %v947_v37, 0.0  ;;  %v1007_v50 = vmul.f32 0.0078125, %v1001_v43  ;;  %v999_v15 = vpop.xlane.xlu1 %998 }
 0x3e6   : > { %v950_v52 = vmax.f32 %v946_v39, 0.0  ;;  %v1006_v38 = vmul.f32 0.0078125, %v999_v15 }
 0x3e7   : > { %v955_v21 = vadd.f32 1e-05, %v951_v44  ;;  %v1015_v53 = vsub.f32 %v1007_v50, %v1011_v49 }
 0x3e8   : > { %v954_v40 = vadd.f32 1e-05, %v950_v52  ;;  %v1014_v35 = vsub.f32 %v1006_v38, %v1010_v42  ;;  %v919_v22 = vpop.xlane.xlu0 %918 }
 0x3e9   : > { %1339 = vrsqrt.f32 %v955_v21  ;;  %v1019_v41 = vmax.f32 %v1015_v53, 0.0  ;;  %v987_v45 = vpop.xlane.xlu1 %986  ;;  %v1701_v54 = vmul.f32 0.0078125, %v919_v22 }
 0x3ea   : > { %1341 = vrsqrt.f32 %v954_v40  ;;  %v1018_v46 = vmax.f32 %v1014_v35, 0.0  ;;  %v992_v8 = vmul.f32 0.0078125, %v987_v45 }
 0x3eb   : > { %v1023_v57 = vadd.f32 1e-05, %v1019_v41  ;;  %v944_v5 = vmul.f32 %v1701_v54, %v1701_v54 }
 0x3ec   : > { %v1022_v59 = vadd.f32 1e-05, %v1018_v46  ;;  %v921_v63 = vpop.xlane.xlu0 %920  ;;  %v1012_v47 = vmul.f32 %v992_v8, %v992_v8 }
 0x3ed   : > { %1343 = vrsqrt.f32 %v1023_v57  ;;  %v935_v4 = vpop.xlane.xlu1 %934  ;;  %v1705_v14 = vmul.f32 0.0078125, %v921_v63 }
 0x3ee   : > { %1345 = vrsqrt.f32 %v1022_v59  ;;  %v940_v9 = vmul.f32 0.0078125, %v935_v4  ;;  %v1032_v59 = vsub.f32 %v1675_v17, %v992_v8 }
 0x3ef   : > { %v945_v36 = vmul.f32 %v1705_v14, %v1705_v14 }
 0x3f0   : > { %v948_v11 = vsub.f32 %v940_v9, %v944_v5  ;;  %v989_v12 = vpop.xlane.xlu0 %988 }
 0x3f1   : > { %v1003_v18 = vpop.xlane.xlu1 %1002  ;;  %v993_v51 = vmul.f32 0.0078125, %v989_v12 }
 0x3f2   : > { %v952_v30 = vmax.f32 %v948_v11, 0.0  ;;  %v1008_v56 = vmul.f32 0.0078125, %v1003_v18 }
 0x3f3   : > { %v1340_v24 = vpop.eup %1339  ;;  %v1013_v42 = vmul.f32 %v993_v51, %v993_v51 }
 0x3f4   : > { %v1342_v27 = vpop.eup %1341  ;;  %v967_v29 = vmul.f32 %v1340_v24, %v963_v23  ;;  %v956_v19 = vadd.f32 1e-05, %v952_v30  ;;  %v1016_v28 = vsub.f32 %v1008_v56, %v1012_v47  ;;  %v937_v10 = vpop.xlane.xlu0 %936 }
 0x3f5   : > { %v966_v34 = vmul.f32 %v1342_v27, %v962_v25  ;;  %v941_v37 = vmul.f32 0.0078125, %v937_v10 }
 0x3f6   : > { %v971_v32 = vmax.f32 %v967_v29, 0.0  ;;  %1347 = vrsqrt.f32 %v956_v19  ;;  %v1020_v39 = vmax.f32 %v1016_v28, 0.0 }
 0x3f7   : > { %v1344_v43 = vpop.eup %1343  ;;  %v970_v31 = vmax.f32 %v966_v34, 0.0  ;;  %v949_v49 = vsub.f32 %v941_v37, %v945_v36 }
 0x3f8   : > { %v1346_v44 = vpop.eup %1345  ;;  %v975_v50 = vadd.f32 %v971_v32, %v1542_v0  ;;  %v1035_v15 = vmul.f32 %v1344_v43, %v1031_v3  ;;  %v1024_v52 = vadd.f32 1e-05, %v1020_v39  ;;  %v1005_v38 = vpop.xlane.xlu0 %1004 }
 0x3f9   : > { %v974_v21 = vadd.f32 %v970_v31, %v1538_v62  ;;  %v1034_v53 = vmul.f32 %v1346_v44, %v1030_v48  ;;  %v953_v58 = vmax.f32 %v949_v49, 0.0  ;;  %v1009_v33 = vmul.f32 0.0078125, %v1005_v38 }
 0x3fa   : > { %979 = vst [vmem:[#allocation2 + $0x10] sm:$0xff] %v975_v50  ;;  %v1039_v40 = vmax.f32 %v1035_v15, 0.0  ;;  %1349 = vrsqrt.f32 %v1024_v52  ;;  %v964_v62 = vsub.f32 %v1673_v16, %v1701_v54  ;;  %v1033_v54 = vsub.f32 %v1684_v26, %v993_v51 }
 0x3fb   : > { %978 = vst [vmem:[#allocation2] sm:$0xff] %v974_v21  ;;  %v1038_v35 = vmax.f32 %v1034_v53, 0.0  ;;  %v957_v55 = vadd.f32 1e-05, %v953_v58  ;;  %v1017_v13 = vsub.f32 %v1009_v33, %v1013_v42  ;;  %v1416_v26 = vmov (!%p1262_p6), 0  }
 0x3fc   : > { %v1043_v22 = vadd.f32 %v1039_v40, %v1536_v61  ;;  %1356 = vset.pattern.permute.xlu1 (!%p1262_p6), %v1416_v26  ;;  %1355 = vset.pattern.permute.xlu0 (!%p1262_p6), %v1416_v26  ;;  %v1118_v21 = vlaneseq (!%p1262_p6) }
 0x3fd   : > { %v1042_v0 = vadd.f32 %v1038_v35, %v1534_v60  ;;  %1351 = vrsqrt.f32 %v957_v55  ;;  %v1021_v41 = vmax.f32 %v1017_v13, 0.0  ;;  %v965_v60 = vsub.f32 %v1679_v20, %v1705_v14  ;;  %v1062_v20 = vld [vmem:[%s1784_s5] sm:$0xff] (!%p1262_p6) }
 0x3fe   : > { %1047 = vst [vmem:[#allocation2 + $0x18] sm:$0xff] %v1043_v22  ;;  %1068 = vperm.xlu0 (!%p1262_p6), %1355, %v1062_v20   ;;  %v1112_v14 = vld [vmem:[#allocation3] sm:$0x1] (!%p1262_p6)  ;;  %v1119_v33 = vshrl.u32 (!%p1262_p6), %v1118_v21, 7  ;;  %v1417_v55 = vmov (!%p1262_p6), 1966171168  }
 0x3ff   : > { %1046 = vst [vmem:[#allocation2 + $0x8] sm:$0xff] %v1042_v0  ;;  %v1025_v45 = vadd.f32 1e-05, %v1021_v41  ;;  %v1128_v13 = vunpack.c.l.s4 (!%p1262_p6), %v1417_v55  ;;  %vm1144_vm1 = vcmp.lt.s32.totalorder (!%p1262_p6), %v1118_v21, 256 }
 0x400   : > { %v1348_v46 = vpop.eup %1347  ;;  %v1120_v41 = vsub.s32 (!%p1262_p6), 0, %v1119_v33 }
 0x401   : > { %v968_v57 = vmul.f32 %v1348_v46, %v964_v62  ;;  %1353 = vrsqrt.f32 %v1025_v45  ;;  %v1056_v27 = vld [vmem:[#allocation2 + $0x10] sm:$0xff] (!%p1262_p6) }
 0x402   : > { %v1054_v24 = vld [vmem:[#allocation2] sm:$0xff] (!%p1262_p6) }
 0x403   : > { %v972_v63 = vmax.f32 %v968_v57, 0.0  ;;  %v1129_v57 = vunpack.c.0.s8 (!%p1262_p6), %v1128_v13 }
 0x404   : > { %v1350_v4 = vpop.eup %1349 }
 0x405   : > { %v976_v5 = vadd.f32 %v972_v63, %v1554_v6  ;;  %v1036_v61 = vmul.f32 %v1350_v4, %v1032_v59  ;;  %v1057_v29 = vld [vmem:[#allocation2 + $0x18] sm:$0xff] (!%p1262_p6) }
 0x406   : > { %v1055_v25 = vld [vmem:[#allocation2 + $0x8] sm:$0xff] (!%p1262_p6) }
 0x407   : > { %v1352_v9 = vpop.eup %1351  ;;  %980 = vst [vmem:[#allocation2 + $0x20] sm:$0xff] %v976_v5  ;;  %v1040_v11 = vmax.f32 %v1036_v61, 0.0 }
 0x408   : > { %v969_v12 = vmul.f32 %v1352_v9, %v965_v60  ;;  %v1132_v60 = vsub.s32 (!%p1262_p6), %v1129_v57, %v1119_v33 }
 0x409   : > { %v1044_v16 = vadd.f32 %v1040_v11, %v1544_v1  ;;  %v1064_v1 = vld [vmem:[%s1784_s5 + $0x10] sm:$0xff] (!%p1262_p6) }
 0x40a   : > { %v973_v18 = vmax.f32 %v969_v12, 0.0  ;;  %1078 = vperm.xlu1 (!%p1262_p6), %1356, %v1064_v1  }
 0x40b   : > { %v1354_v23 = vpop.eup %1353  ;;  %1048 = vst [vmem:[#allocation2 + $0x28] sm:$0xff] %v1044_v16 }
 0x40c   : > { %v977_v17 = vadd.f32 %v973_v18, %v1556_v7  ;;  %v1037_v8 = vmul.f32 %v1354_v23, %v1033_v54  ;;  %1053 = sbr.rel (%p1262_p6) target bundleno = 1194 (0x4aa), region = 56  ;;  %v1063_v7 = vld [vmem:[%s1784_s5 + $0x8] sm:$0xff] (!%p1262_p6) }
 0x40d   : > { %1073 = vperm.xlu0 (!%p1262_p6), %1355, %v1063_v7  }
 0x40e   : > { %981 = vst [vmem:[#allocation2 + $0x30] sm:$0xff] %v977_v17  ;;  %v1041_v6 = vmax.f32 %v1037_v8, 0.0  ;;  %v1058_v19 = vld [vmem:[#allocation2 + $0x20] sm:$0xff] (!%p1262_p6) }
 0x410   : > { %v1045_v47 = vadd.f32 %v1041_v6, %v1546_v2  ;;  %v1065_v2 = vld [vmem:[%s1784_s5 + $0x18] sm:$0xff] (!%p1262_p6) }
 0x411   : > { %1083 = vperm.xlu1 (!%p1262_p6), %1356, %v1065_v2   ;;  %1115 = vperm.xlu0 (!%p1262_p6), %1355, %v1112_v14  }
 0x412   : > { %1049 = vst [vmem:[#allocation2 + $0x38] sm:$0xff] %v1045_v47  ;;  %v1059_v51 = vld [vmem:[#allocation2 + $0x28] sm:$0xff] (!%p1262_p6) }
 0x415   : > { %v1060_v32 = vld [vmem:[#allocation2 + $0x30] sm:$0xff] }
 0x419   : > { %v1061_v39 = vld [vmem:[#allocation2 + $0x38] sm:$0xff] }
 0x47d   : > { %v1069_v56 = vpop.permute.xlu0 %1068 }
 0x47e   : > { %v1086_v10 = vmul.f32 %v1069_v56, %v1054_v24  ;;  %v1087_v34 = vmul.f32 %v1069_v56, %v1055_v25 }
 0x489   : > { %v1079_v30 = vpop.permute.xlu1 %1078 }
 0x48a   : > { %v1090_v43 = vmul.f32 %v1079_v30, %v1058_v19  ;;  %v1091_v48 = vmul.f32 %v1079_v30, %v1059_v51 }
 0x48c   : > { %v1074_v28 = vpop.permute.xlu0 %1073 }
 0x48d   : > { %v1088_v36 = vmul.f32 %v1074_v28, %v1056_v27  ;;  %v1089_v37 = vmul.f32 %v1074_v28, %v1057_v29 }
 0x48f   : > { %v1094_v31 = vadd.f32 %v1088_v36, %v1086_v10  ;;  %v1103_v49 = vadd.f32 %v1089_v37, %v1087_v34 }
 0x490   : > { %v1084_v3 = vpop.permute.xlu1 %1083  ;;  %v1116_v46 = vpop.permute.xlu0 %1115 }
 0x491   : > { %v1092_v44 = vmul.f32 %v1084_v3, %v1060_v32  ;;  %v1093_v50 = vmul.f32 %v1084_v3, %v1061_v39  ;;  %v1095_v15 = vadd.f32 %v1094_v31, %v1090_v43  ;;  %v1104_v42 = vadd.f32 %v1103_v49, %v1091_v48 }
 0x492   : > { %v1121_v61 = vrot.slane %v1116_v46, %v1120_v41 }
 0x493   : > { %v1096_v52 = vadd.f32 %v1095_v15, %v1092_v44  ;;  %v1105_v38 = vadd.f32 %v1104_v42, %v1093_v50 }
 0x495   : > { %v1097_v53 = vrot.slane %v1096_v52, 4  ;;  %v1106_v58 = vrot.slane %v1105_v38, 4 }
 0x497   : > { %v1098_v40 = vadd.f32 %v1097_v53, %v1096_v52  ;;  %v1107_v35 = vadd.f32 %v1106_v58, %v1105_v38 }
 0x499   : > { %v1099_v22 = vrot.slane %v1098_v40, 2  ;;  %v1108_v0 = vrot.slane %v1107_v35, 2 }
 0x49b   : > { %v1100_v62 = vadd.f32 %v1099_v22, %v1098_v40  ;;  %v1109_v45 = vadd.f32 %v1108_v0, %v1107_v35 }
 0x49d   : > { %v1101_v59 = vrot.slane %v1100_v62, 1  ;;  %v1110_v63 = vrot.slane %v1109_v45, 1 }
 0x49f   : > { %v1102_v4 = vadd.f32 %v1101_v59, %v1100_v62  ;;  %v1111_v5 = vadd.f32 %v1110_v63, %v1109_v45 }
 0x4a1   : > { %v1122_v9 = vadd.f32 %v1121_v61, %v1102_v4  ;;  %v1123_v11 = vadd.f32 %v1121_v61, %v1111_v5 }
 0x4a3   : > { %v1126_v12 = vcombine.low %v1122_v9, %v1123_v11 }
 0x4a5   : > { %v1133_v16 = vrot.slane %v1126_v12, %v1132_v60 }
 0x4a7   : > { %v1140_v54 = vrot.slane %v1133_v16, %v1132_v60 }
 0x4a9   : > { %1146 = vst.msk [vmem:[#allocation4] sm:$0x3] %vm1144_vm1, %v1140_v54 }
 0x4aa PF: > { %p1744_p7 = scmp.eq.s32.totalorder %s1234_s6, 1  ;;  %s1418_s23 = smov [#allocation4]  }
 0x4ab   : > { %s1157_s24 = sshll.u32 %s1418_s23, 4  ;;  %s1158_s24 = int_to_ptr.vmem [resolvable:$true] %s1157_s24 }
 0x4ac   : > { %s1357_s25 = scalar_lea.vmem %s1158_s24, 32  ;;  %p1364_p11 = scmp.lt.s32.totalorder %s1158_s24, %s1158_s24 }
 0x4ad   : > { %p1358_p8 = scmp.ne.s32.totalorder %s1158_s24, %s1357_s25  ;;  %p1365_p12 = scmp.lt.s32.totalorder %s1357_s25, %s1357_s25 }
 0x4af   : > { %p1359_p9 = pnand %p1358_p8, %p1744_p7  ;;  %p1366_p13 = por %p1365_p12, %p1364_p11 }
 0x4b1   : > { %p1360_p10 = pneg %p1359_p9 }
 0x4b3   : > { %p1367_p0 = pnand %p1366_p13, %p1360_p10 }
 0x4b5   : > { %1370 = shalt.err (!%p1367_p0)
}
 0x4b6   : > { %s1371_s6 = scalar_lea.hbm %s1786_s7, 32 }
 0x4b7   : > { %p1372_p1 = scmp.ne.s32.totalorder %s1786_s7, %s1371_s6  ;;  %p1377_p4 = scmp.lt.u32.totalorder %s1371_s6, %s1786_s7 }
 0x4b9   : > { %p1373_p2 = pnand %p1372_p1, %p1744_p7 }
 0x4bb   : > { %p1374_p3 = pneg %p1373_p2 }
 0x4bd   : > { %p1379_p5 = pnand %p1377_p4, %p1374_p3 }
 0x4bf   : > { %1382 = shalt.err (!%p1379_p5)
}
 0x4c0   : > { %1270 = dma.vmem_to_hbm [thread:$0]  (%p1744_p7), %s1158_s24, 32, %s1786_s7, [#allocation5]  }
 0x4c1   : > { %1396 = dma.done.wait (%p1744_p7), [#allocation5], 32  }
 0x4c2   : > { %1398 = vsyncadd (%p1744_p7), [#allocation5], 4294967264 }
 0x4c3 PF: > { %s20_s28 = sadd.s32 1, %s1409_s28   ;;  %s1788_s26 = smov %s1405_s27 }
 0x4c4   : > { %p17_p6 = scmp.ge.s32.totalorder %s20_s28, 4   ;;  %s1789_s27 = smov %s1791_s29 }
 0x4c6   :  { %19 = sbr.rel (!%p17_p6) target bundleno = 5 (0x5), region = 92 }
 0x4cd   :  { %1170 = vsyncpa [#allocation5], 1 }
 0x4ce   :  { %1172 = vsyncpa [#allocation5 + $0x1], 1 }

</bundles_post_ra>
